<compile_context>
chip_gen: v5e
topology: v5e:2x2
jax: 0.10.0
libtpu: 0.0.40
codegen_flags: <defaults>
</compile_context>

<pallas_src>
import jax
import jax.numpy as jnp
from jax.experimental import pallas as pl
from jax.experimental.pallas import tpu as pltpu

BN_EPS = 1e-5


def focus_kernel(p_ref, w_ref, g_ref, b_ref, o_ref):
    """p:(M,K) bf16, w:(K,Np) bf16, g/b:(1,Np) f32, out:(M,Np) f32.

    Fused: 1x1 conv (MXU matmul, f32 accumulate) -> train-mode BatchNorm -> SiLU.
    """
    # Convolution (1x1 over the space-to-depth channels) as one MXU matmul.
    conv = jnp.dot(p_ref[...], w_ref[...], preferred_element_type=jnp.float32)   # (M, Np) f32

    # One-pass batch statistics over axis 0 (== N*H*W of the conv output).
    m = jnp.float32(conv.shape[0])
    s1 = jnp.sum(conv, axis=0, keepdims=True)                  # (1, Np)
    s2 = jnp.sum(conv * conv, axis=0, keepdims=True)           # (1, Np)
    mean = s1 / m
    var = jnp.maximum(s2 / m - mean * mean, 0.0)               # biased variance (PyTorch train mode)
    inv_std = jax.lax.rsqrt(var + BN_EPS)                      # EUP slot

    # Fold BN into a single per-channel affine: y = conv * a + c.
    a = g_ref[...] * inv_std
    c = b_ref[...] - mean * a
    y = conv * a + c

    # SiLU: y * sigmoid(y); exp + approx reciprocal stay on the EUP slot.
    o_ref[...] = y * pl.reciprocal(1.0 + jnp.exp(-y), approx=True)


def focus_forward(x_nchw, conv_w, gamma, beta):
    """Focus forward. x:(B,c1,H,W) f32, conv_w:(c2,4*c1,1,1), gamma/beta:(c2,).
    Returns (B, c2, H//2, W//2) f32."""
    B, C, H, W = x_nchw.shape
    c2 = conv_w.shape[0]
    h, w = H // 2, W // 2
    M, K = B * h * w, 4 * C
    n_pad = ((c2 + 127) // 128) * 128          # lane-dense output width

    # Space-to-depth + channels-last in ONE fused reshape/transpose (no duplication).
    # K-column order is (2*dx + dy)*C + c, matching
    # torch.cat([x[::2,::2], x[1::2,::2], x[::2,1::2], x[1::2,1::2]], dim=1).
    xt = jnp.transpose(x_nchw.reshape(B, C, h, 2, w, 2), (0, 2, 4, 5, 3, 1))   # (B,h,w,dx,dy,C)
    patches = xt.reshape(M, K).astype(jnp.bfloat16)

    # PyTorch 1x1 conv weight (c2, 4C, 1, 1) -> (K, c2), zero-padded to (K, n_pad).
    w_mat = jnp.transpose(conv_w.reshape(c2, K), (1, 0)).astype(jnp.bfloat16)
    w_mat = jnp.pad(w_mat, ((0, 0), (0, n_pad - c2)))
    g_row = jnp.pad(gamma.astype(jnp.float32).reshape(1, c2), ((0, 0), (0, n_pad - c2)))
    b_row = jnp.pad(beta.astype(jnp.float32).reshape(1, c2), ((0, 0), (0, n_pad - c2)))

    out = pl.pallas_call(
        focus_kernel,
        out_shape=jax.ShapeDtypeStruct((M, n_pad), jnp.float32),
        grid=(1,),
        in_specs=[
            pl.BlockSpec((M, K), lambda i: (0, 0)),
            pl.BlockSpec((K, n_pad), lambda i: (0, 0)),
            pl.BlockSpec((1, n_pad), lambda i: (0, 0)),
            pl.BlockSpec((1, n_pad), lambda i: (0, 0)),
        ],
        out_specs=pl.BlockSpec((M, n_pad), lambda i: (0, 0)),
        compiler_params=pltpu.CompilerParams(dimension_semantics=("arbitrary",)),
    )(patches, w_mat, g_row, b_row)

    # Slice the real channels and restore NCHW (fused by XLA into the transpose).
    y = out[:, :c2].reshape(B, h, w, c2)
    return jnp.transpose(y, (0, 3, 1, 2))


def focus_reference(x, conv_w, gamma, beta):
    """Plain-JAX reference matching the PyTorch module (train-mode BN, SiLU)."""
    p = jnp.concatenate([x[..., ::2, ::2], x[..., 1::2, ::2],
                         x[..., ::2, 1::2], x[..., 1::2, 1::2]], axis=1)        # (B, 4C, h, w)
    y = jnp.einsum('ok,bkhw->bohw', conv_w.reshape(conv_w.shape[0], -1), p)
    mean = y.mean(axis=(0, 2, 3), keepdims=True)
    var = y.var(axis=(0, 2, 3), keepdims=True)                                   # biased
    y = (y - mean) * jax.lax.rsqrt(var + BN_EPS)
    y = y * gamma.reshape(1, -1, 1, 1) + beta.reshape(1, -1, 1, 1)
    return y * jax.nn.sigmoid(y)


if __name__ == "__main__":
    B, c1, H, W = 2, 4, 16, 16
    c2 = 64

    key = jax.random.PRNGKey(0)
    kx, kw = jax.random.split(key, 2)
    x = jax.random.normal(kx, (B, c1, H, W), dtype=jnp.float32)
    conv_w = jax.random.normal(kw, (c2, 4 * c1, 1, 1), dtype=jnp.float32) * 0.1
    gamma = jnp.ones((c2,), dtype=jnp.float32)   # BatchNorm2d default weight
    beta = jnp.zeros((c2,), dtype=jnp.float32)   # BatchNorm2d default bias

    out = jax.jit(focus_forward)(x, conv_w, gamma, beta)
    out = jax.block_until_ready(out)
    assert out.shape == (B, c2, H // 2, W // 2)

    ref = focus_reference(x, conv_w, gamma, beta)
    max_err = float(jnp.max(jnp.abs(out - ref)))
    assert jnp.allclose(out, ref, rtol=5e-2, atol=5e-2), f"max abs err {max_err}"
    print("KERNEL_OK")
</pallas_src>

<mosaic_0001>
module attributes {stable_mosaic.version = 11 : i64} {
  func.func @focus_kernel(%arg0: i32, %arg1: memref<128x16xbf16, #tpu.memory_space<vmem>>, %arg2: memref<16x128xbf16, #tpu.memory_space<vmem>>, %arg3: memref<1x128xf32, #tpu.memory_space<vmem>>, %arg4: memref<1x128xf32, #tpu.memory_space<vmem>>, %arg5: memref<128x128xf32, #tpu.memory_space<vmem>>) attributes {dimension_semantics = [#tpu.dimension_semantics<arbitrary>], iteration_bounds = array<i64: 1>, scalar_prefetch = 0 : i64, scratch_operands = 0 : i64, tpu.core_type = #tpu.core_type<tc>, window_params = [{pipeline_mode = #tpu.pipeline_mode<synchronous>, transform_indices = @transform_0, window_bounds = array<i64: 128, 16>}, {pipeline_mode = #tpu.pipeline_mode<synchronous>, transform_indices = @transform_1, window_bounds = array<i64: 16, 128>}, {pipeline_mode = #tpu.pipeline_mode<synchronous>, transform_indices = @transform_2, window_bounds = array<i64: 1, 128>}, {pipeline_mode = #tpu.pipeline_mode<synchronous>, transform_indices = @transform_3, window_bounds = array<i64: 1, 128>}, {pipeline_mode = #tpu.pipeline_mode<synchronous>, transform_indices = @transform_4, window_bounds = array<i64: 128, 128>}]} {
    %c0 = arith.constant 0 : index
    %c0_0 = arith.constant 0 : index
    %0 = vector.load %arg1[%c0, %c0_0] : memref<128x16xbf16, #tpu.memory_space<vmem>>, vector<128x16xbf16>
    %c0_1 = arith.constant 0 : index
    %c0_2 = arith.constant 0 : index
    %1 = vector.load %arg2[%c0_1, %c0_2] : memref<16x128xbf16, #tpu.memory_space<vmem>>, vector<16x128xbf16>
    %cst = arith.constant dense<0.000000e+00> : vector<128x128xf32>
    %2 = tpu.matmul %0, %1, %cst {dimension_numbers = #tpu.dot_dimension_numbers<[1], [0], [0], [1], [0, 0, 1, 1], [], []>} : vector<128x16xbf16>, vector<16x128xbf16>, vector<128x128xf32> -> vector<128x128xf32>
    %cst_3 = arith.constant dense<0.000000e+00> : vector<128xf32>
    %3 = vector.multi_reduction <add>, %2, %cst_3 [0] : vector<128x128xf32> to vector<128xf32>
    %4 = vector.shape_cast %3 : vector<128xf32> to vector<1x128xf32>
    %5 = arith.mulf %2, %2 : vector<128x128xf32>
    %cst_4 = arith.constant dense<0.000000e+00> : vector<128xf32>
    %6 = vector.multi_reduction <add>, %5, %cst_4 [0] : vector<128x128xf32> to vector<128xf32>
    %7 = vector.shape_cast %6 : vector<128xf32> to vector<1x128xf32>
    %cst_5 = arith.constant 1.280000e+02 : f32
    %8 = vector.broadcast %cst_5 : f32 to vector<1x128xf32>
    %9 = arith.divf %4, %8 : vector<1x128xf32>
    %cst_6 = arith.constant 1.280000e+02 : f32
    %10 = vector.broadcast %cst_6 : f32 to vector<1x128xf32>
    %11 = arith.divf %7, %10 : vector<1x128xf32>
    %12 = arith.mulf %9, %9 : vector<1x128xf32>
    %13 = arith.subf %11, %12 : vector<1x128xf32>
    %cst_7 = arith.constant 0.000000e+00 : f32
    %14 = vector.broadcast %cst_7 : f32 to vector<1x128xf32>
    %15 = arith.maximumf %13, %14 : vector<1x128xf32>
    %cst_8 = arith.constant 9.99999974E-6 : f32
    %16 = vector.broadcast %cst_8 : f32 to vector<1x128xf32>
    %17 = arith.addf %15, %16 : vector<1x128xf32>
    %18 = math.rsqrt %17 : vector<1x128xf32>
    %c0_9 = arith.constant 0 : index
    %c0_10 = arith.constant 0 : index
    %19 = vector.load %arg3[%c0_9, %c0_10] : memref<1x128xf32, #tpu.memory_space<vmem>>, vector<1x128xf32>
    %20 = arith.mulf %19, %18 : vector<1x128xf32>
    %c0_11 = arith.constant 0 : index
    %c0_12 = arith.constant 0 : index
    %21 = vector.load %arg4[%c0_11, %c0_12] : memref<1x128xf32, #tpu.memory_space<vmem>>, vector<1x128xf32>
    %22 = arith.mulf %9, %20 : vector<1x128xf32>
    %23 = arith.subf %21, %22 : vector<1x128xf32>
    %24 = vector.broadcast %20 : vector<1x128xf32> to vector<128x128xf32>
    %25 = arith.mulf %2, %24 : vector<128x128xf32>
    %26 = vector.broadcast %23 : vector<1x128xf32> to vector<128x128xf32>
    %27 = arith.addf %25, %26 : vector<128x128xf32>
    %cst_13 = arith.constant 0.000000e+00 : f32
    %28 = vector.broadcast %cst_13 : f32 to vector<128x128xf32>
    %29 = arith.subf %28, %27 : vector<128x128xf32>
    %30 = math.exp %29 : vector<128x128xf32>
    %cst_14 = arith.constant 1.000000e+00 : f32
    %31 = vector.broadcast %cst_14 : f32 to vector<128x128xf32>
    %32 = arith.addf %31, %30 : vector<128x128xf32>
    %33 = tpu.reciprocal %32 {approx = true} : vector<128x128xf32> -> vector<128x128xf32>
    %34 = arith.mulf %27, %33 : vector<128x128xf32>
    %c0_15 = arith.constant 0 : index
    %c0_16 = arith.constant 0 : index
    %35 = vector.load %arg5[%c0_15, %c0_16] : memref<128x128xf32, #tpu.memory_space<vmem>>, vector<128x128xf32>
    tpu.vector_store %arg5[%c0_15, %c0_16], %34 {strides = array<i32>} : memref<128x128xf32, #tpu.memory_space<vmem>>, vector<128x128xf32>,
    return
  }
  func.func @transform_0(%arg0: i32) -> (i32, i32) {
    %c0_i32 = arith.constant 0 : i32
    %c0_i32_0 = arith.constant 0 : i32
    %c0_i32_1 = arith.constant 0 : i32
    return %c0_i32, %c0_i32_0 : i32, i32
  }
  func.func @transform_1(%arg0: i32) -> (i32, i32) {
    %c0_i32 = arith.constant 0 : i32
    %c0_i32_0 = arith.constant 0 : i32
    %c0_i32_1 = arith.constant 0 : i32
    return %c0_i32, %c0_i32_0 : i32, i32
  }
  func.func @transform_2(%arg0: i32) -> (i32, i32) {
    %c0_i32 = arith.constant 0 : i32
    %c0_i32_0 = arith.constant 0 : i32
    %c0_i32_1 = arith.constant 0 : i32
    return %c0_i32, %c0_i32_0 : i32, i32
  }
  func.func @transform_3(%arg0: i32) -> (i32, i32) {
    %c0_i32 = arith.constant 0 : i32
    %c0_i32_0 = arith.constant 0 : i32
    %c0_i32_1 = arith.constant 0 : i32
    return %c0_i32, %c0_i32_0 : i32, i32
  }
  func.func @transform_4(%arg0: i32) -> (i32, i32) {
    %c0_i32 = arith.constant 0 : i32
    %c0_i32_0 = arith.constant 0 : i32
    %c0_i32_1 = arith.constant 0 : i32
    return %c0_i32, %c0_i32_0 : i32, i32
  }
}

</mosaic_0001>

<bundles_post_ra>
// kernel: focus_forward.1
= control target key start
LH: loop header
LB: loop body
LE: loop exit
PB: predicated region body
PF: predicated region fallthrough
CT: control target
= control target key end

     0   :  { %vm83_vm0 = vcmask 130048   ;;  %s792_s0 = inlined_call_operand.vmem [shape: bf16[128,16], index: 0, kind: input, shape index: {}]   ;;  %s793_s1 = inlined_call_operand.vmem [shape: bf16[16,128], index: 1, kind: input, shape index: {}]   ;;  %s794_s2 = inlined_call_operand.vmem [shape: f32[1,128], index: 2, kind: input, shape index: {}]   ;;  %s795_s3 = inlined_call_operand.vmem [shape: f32[1,128], index: 3, kind: input, shape index: {}]   ;;  %s796_s4 = inlined_call_operand.hbm [shape: f32[128,128], index: 4, kind: output, shape index: {}]  }
   0x1   :  { %v463_v0 = vld [vmem:[%s793_s1] sm:$0xff]  ;;  %v457_v2 = vld [vmem:[%s792_s0 + $0x10] sm:$0xff] }
   0x2   :  { %v455_v1 = vld [vmem:[%s792_s0] sm:$0xff]  ;;  %115 = vmatpush.bf16.msra.mxu0 %v463_v0  ;;  %464 = vmatpush.bf16.msra.mxu1 %v463_v0  ;;  %v461_v4 = vld [vmem:[%s792_s0 + $0x30] sm:$0xff] }
   0x3   :  { %v459_v3 = vld [vmem:[%s792_s0 + $0x20] sm:$0xff]  ;;  %465 = vmatpush.bf16.msra.mxu2 %v463_v0  ;;  %466 = vmatpush.bf16.msra.mxu3 %v463_v0 }
   0x4   :  { %9 = vsyncpa [#allocation3], 0  ;;  %v456_v5 = vld [vmem:[%s792_s0 + $0x8] sm:$0xff]  ;;  %v458_v6 = vld [vmem:[%s792_s0 + $0x18] sm:$0xff]  ;;  %v565_v46 = vmov 128.0   ;;  %s399_s11 = sshll.u32 %s796_s4, 4  ;;  %s400_s11 = int_to_ptr.hbm [resolvable:$true] %s399_s11 }
   0x5   :  { %447 = vmatmul.msk.bf16.vlgmr.msra.gmra.mxu0 %vm83_vm0, %v455_v1  ;;  %449 = vmatmul.msk.bf16.vlgmr.msra.gmra.mxu1 %vm83_vm0, %v457_v2  ;;  %v460_v7 = vld [vmem:[%s792_s0 + $0x28] sm:$0xff]  ;;  %v462_v8 = vld [vmem:[%s792_s0 + $0x38] sm:$0xff]  ;;  %471 = vrcp.f32 %v565_v46  ;;  %s567_s4 = smov 128   ;;  %s568_s12 = smov 8  }
   0x6   :  { %451 = vmatmul.msk.bf16.vlgmr.msra.gmra.mxu2 %vm83_vm0, %v459_v3  ;;  %453 = vmatmul.msk.bf16.vlgmr.msra.gmra.mxu3 %vm83_vm0, %v461_v4 }
   0xb   :  { %v472_v55 = vpop.eup %471 }
   0xc   :  { %v216_v62 = vmul.f32 128.0, %v472_v55  ;;  %vm220_vm1 = vweird.f32 %v472_v55 }
  0x15   :  { %448 = vmatmul.msk.bf16.gmra.mxu0 %vm83_vm0, %v456_v5  ;;  %450 = vmatmul.msk.bf16.gmra.mxu1 %vm83_vm0, %v458_v6  ;;  %v217_v6 = vsub.f32 1.0, %v216_v62 }
  0x16   :  { %452 = vmatmul.msk.bf16.gmra.mxu2 %vm83_vm0, %v460_v7  ;;  %454 = vmatmul.msk.bf16.gmra.mxu3 %vm83_vm0, %v462_v8 }
  0x82   :  { %v629_v9 = vpop.f32.mrf.mxu0  ;;  %v631_v10 = vpop.f32.mrf.mxu1 }
  0x83   :  { %v178_v19 = vmul.f32 %v629_v9, %v629_v9  ;;  %v182_v29 = vmul.f32 %v631_v10, %v631_v10 }
  0x89   :  { %v635_v12 = vpop.f32.mrf.mxu2  ;;  %v641_v15 = vpop.f32.mrf.mxu3 }
  0x8a   :  { %v633_v11 = vpop.f32.mrf.mxu0  ;;  %v637_v13 = vpop.f32.mrf.mxu1  ;;  %v186_v43 = vmul.f32 %v635_v12, %v635_v12  ;;  %v190_v59 = vmul.f32 %v641_v15, %v641_v15 }
  0x8b   :  { %v179_v17 = vmul.f32 %v633_v11, %v633_v11  ;;  %v157_v20 = vadd.f32 %v633_v11, %v629_v9  ;;  %v183_v33 = vmul.f32 %v637_v13, %v637_v13 }
  0x8d   :  { %v194_v22 = vadd.f32 %v179_v17, %v178_v19 }
  0x91   :  { %v643_v16 = vpop.f32.mrf.mxu2  ;;  %v661_v28 = vpop.f32.mrf.mxu3 }
  0x92   :  { %v639_v14 = vpop.f32.mrf.mxu0  ;;  %v647_v18 = vpop.f32.mrf.mxu1  ;;  %v187_v48 = vmul.f32 %v643_v16, %v643_v16  ;;  %v191_v63 = vmul.f32 %v661_v28, %v661_v28 }
  0x93   :  { %v180_v21 = vmul.f32 %v639_v14, %v639_v14  ;;  %v158_v23 = vadd.f32 %v157_v20, %v639_v14  ;;  %v184_v37 = vmul.f32 %v647_v18, %v647_v18 }
  0x95   :  { %v195_v25 = vadd.f32 %v194_v22, %v180_v21  ;;  %v218_v21 = vmul.f32 %v472_v55, %v217_v6 }
  0x99   :  { %v666_v32 = vpop.f32.mrf.mxu2  ;;  %v682_v47 = vpop.f32.mrf.mxu3 }
  0x9a   :  { %v656_v24 = vpop.f32.mrf.mxu0  ;;  %v671_v36 = vpop.f32.mrf.mxu1  ;;  %v188_v53 = vmul.f32 %v666_v32, %v666_v32  ;;  %v192_v4 = vmul.f32 %v682_v47, %v682_v47 }
  0x9b   :  { %v159_v26 = vadd.f32 %v158_v23, %v656_v24  ;;  %v181_v27 = vmul.f32 %v656_v24, %v656_v24  ;;  %v185_v41 = vmul.f32 %v671_v36, %v671_v36 }
  0x9d   :  { %v160_v30 = vadd.f32 %v159_v26, %v631_v10  ;;  %v196_v31 = vadd.f32 %v195_v25, %v181_v27  ;;  %v219_v27 = vadd.f32 %v472_v55, %v218_v21 }
  0x9f   :  { %v197_v34 = vadd.f32 %v196_v31, %v182_v29  ;;  %v161_v35 = vadd.f32 %v160_v30, %v637_v13 }
  0xa1   :  { %v162_v38 = vadd.f32 %v161_v35, %v647_v18  ;;  %v198_v39 = vadd.f32 %v197_v34, %v183_v33  ;;  %v687_v51 = vpop.f32.mrf.mxu2  ;;  %v154_v2 = vpop.f32.mrf.mxu3  ;;  %v221_v34 = vsel %vm220_vm1, %v472_v55, %v219_v27 }
  0xa2   :  { %v189_v58 = vmul.f32 %v687_v51, %v687_v51  ;;  %v193_v17 = vmul.f32 %v154_v2, %v154_v2 }
  0xa3   :  { %v163_v40 = vadd.f32 %v162_v38, %v671_v36  ;;  %v199_v42 = vadd.f32 %v198_v39, %v184_v37 }
  0xa5   :  { %v164_v44 = vadd.f32 %v163_v40, %v635_v12  ;;  %v200_v45 = vadd.f32 %v199_v42, %v185_v41 }
  0xa7   :  { %v201_v49 = vadd.f32 %v200_v45, %v186_v43  ;;  %v165_v50 = vadd.f32 %v164_v44, %v643_v16 }
  0xa9   :  { %v166_v52 = vadd.f32 %v165_v50, %v666_v32  ;;  %v202_v54 = vadd.f32 %v201_v49, %v187_v48 }
  0xab   :  { %v203_v56 = vadd.f32 %v202_v54, %v188_v53  ;;  %v167_v57 = vadd.f32 %v166_v52, %v687_v51  ;;  %v238_v53 = vld [vmem:[%s794_s2] sm:$0x1]  ;;  %s566_s2 = smov [#allocation2]  }
  0xad   :  { %v168_v60 = vadd.f32 %v167_v57, %v641_v15  ;;  %v204_v61 = vadd.f32 %v203_v56, %v189_v58  ;;  %v240_v56 = vld [vmem:[%s795_s3] sm:$0x1]  ;;  %s397_s3 = sshll.u32 %s566_s2, 4  ;;  %s398_s3 = int_to_ptr.vmem [resolvable:$true] %s397_s3 }
  0xaf   :  { %v205_v0 = vadd.f32 %v204_v61, %v190_v59  ;;  %v169_v1 = vadd.f32 %v168_v60, %v661_v28 }
  0xb1   :  { %v170_v3 = vadd.f32 %v169_v1, %v682_v47  ;;  %v206_v5 = vadd.f32 %v205_v0, %v191_v63 }
  0xb3   :  { %v207_v7 = vadd.f32 %v206_v5, %v192_v4  ;;  %v171_v8 = vadd.f32 %v170_v3, %v154_v2 }
  0xb5   :  { %v172_v19 = vrot.slane %v171_v8, 4  ;;  %v208_v20 = vadd.f32 %v207_v7, %v193_v17 }
  0xb7   :  { %v173_v22 = vadd.f32 %v172_v19, %v171_v8  ;;  %v209_v23 = vrot.slane %v208_v20, 4 }
  0xb9   :  { %v174_v25 = vrot.slane %v173_v22, 2  ;;  %v210_v26 = vadd.f32 %v209_v23, %v208_v20 }
  0xbb   :  { %v175_v29 = vadd.f32 %v174_v25, %v173_v22  ;;  %v211_v30 = vrot.slane %v210_v26, 2 }
  0xbd   :  { %v176_v31 = vrot.slane %v175_v29, 1  ;;  %v212_v33 = vadd.f32 %v211_v30, %v210_v26 }
  0xbf   :  { %v177_v35 = vadd.f32 %v176_v31, %v175_v29  ;;  %v213_v37 = vrot.slane %v212_v33, 1 }
  0xc1   :  { %v214_v38 = vadd.f32 %v213_v37, %v212_v33  ;;  %v222_v39 = vmul.f32 %v221_v34, %v177_v35 }
  0xc3   :  { %v223_v40 = vmul.f32 %v221_v34, %v214_v38  ;;  %v224_v41 = vmul.f32 %v222_v39, %v222_v39 }
  0xc5   :  { %v225_v42 = vsub.f32 %v223_v40, %v224_v41 }
  0xc7   :  { %v226_v43 = vmax.f32 %v225_v42, 0.0 }
  0xc9   :  { %v227_v44 = vadd.f32 1e-05, %v226_v43 }
  0xcb   :  { %473 = vrsqrt.f32 %v227_v44  ;;  %vm234_vm3 = vweird.f32 %v227_v44 }
  0xd1   :  { %v474_v45 = vpop.eup %473 }
  0xd2   :  { %v229_v46 = vmul.f32 %v474_v45, %v227_v44  ;;  %vm235_vm2 = vweird.f32 %v474_v45 }
  0xd3   :  { %vm236_vm4 = vmor %vm234_vm3, %vm235_vm2 }
  0xd4   :  { %v230_v48 = vmul.f32 %v474_v45, %v229_v46 }
  0xd6   :  { %v231_v49 = vmul.f32 0.5, %v230_v48 }
  0xd8   :  { %v232_v50 = vsub.f32 1.5, %v231_v49 }
  0xda   :  { %v233_v52 = vmul.f32 %v474_v45, %v232_v50 }
  0xdc   :  { %v237_v54 = vsel %vm236_vm4, %v474_v45, %v233_v52 }
  0xdd   :  { %v239_v55 = vmul.f32 %v238_v53, %v237_v54 }
  0xdf   :  { %v241_v57 = vmul.f32 %v239_v55, %v222_v39  ;;  %v244_v58 = vperm.slane %v239_v55, 0 }
  0xe1   :  { %v242_v59 = vsub.f32 %v240_v56, %v241_v57  ;;  %v261_v60 = vmul.f32 %v244_v58, %v154_v2  ;;  %v246_v62 = vmul.f32 %v244_v58, %v629_v9  ;;  %v247_v63 = vmul.f32 %v244_v58, %v633_v11 }
  0xe2   :  { %v248_v0 = vmul.f32 %v244_v58, %v639_v14  ;;  %v249_v3 = vmul.f32 %v244_v58, %v656_v24  ;;  %v250_v2 = vmul.f32 %v244_v58, %v631_v10  ;;  %v251_v9 = vmul.f32 %v244_v58, %v637_v13 }
  0xe3   :  { %v263_v61 = vperm.slane %v242_v59, 0  ;;  %v252_v11 = vmul.f32 %v244_v58, %v647_v18  ;;  %v253_v17 = vmul.f32 %v244_v58, %v671_v36  ;;  %v254_v20 = vmul.f32 %v244_v58, %v635_v12 }
  0xe4   :  { %v255_v13 = vmul.f32 %v244_v58, %v643_v16  ;;  %v256_v36 = vmul.f32 %v244_v58, %v666_v32  ;;  %v257_v25 = vmul.f32 %v244_v58, %v687_v51  ;;  %v258_v26 = vmul.f32 %v244_v58, %v641_v15 }
  0xe5   :  { %v713_v1 = vadd.f32 %v263_v61, %v261_v60  ;;  %v716_v4 = vadd.f32 %v263_v61, %v246_v62  ;;  %v718_v5 = vadd.f32 %v263_v61, %v247_v63  ;;  %v720_v6 = vadd.f32 %v263_v61, %v248_v0 }
  0xe6   :  { %v725_v8 = vadd.f32 %v263_v61, %v249_v3  ;;  %v729_v24 = vadd.f32 %v263_v61, %v250_v2  ;;  %v731_v19 = vadd.f32 %v263_v61, %v251_v9  ;;  %v738_v23 = vadd.f32 %v263_v61, %v252_v11 }
  0xe7   :  { %v296_v7 = vsub.f32 0.0, %v713_v1  ;;  %v281_v21 = vsub.f32 0.0, %v716_v4  ;;  %v282_v22 = vsub.f32 0.0, %v718_v5  ;;  %v283_v10 = vsub.f32 0.0, %v720_v6 }
  0xe8   :  { %v284_v18 = vsub.f32 0.0, %v725_v8  ;;  %v744_v12 = vadd.f32 %v263_v61, %v253_v17  ;;  %v259_v27 = vmul.f32 %v244_v58, %v661_v28  ;;  %v747_v29 = vadd.f32 %v263_v61, %v254_v20 }
  0xe9   :  { %v327_v14 = vmul.f32 1.442695, %v296_v7  ;;  %v285_v30 = vsub.f32 0.0, %v729_v24  ;;  %v286_v16 = vsub.f32 0.0, %v731_v19  ;;  %v751_v31 = vadd.f32 %v263_v61, %v255_v13 }
  0xea   :  { %v297_v33 = vmul.f32 1.442695, %v281_v21  ;;  %v299_v34 = vmul.f32 1.442695, %v282_v22  ;;  %v301_v35 = vmul.f32 1.442695, %v283_v10  ;;  %v260_v32 = vmul.f32 %v244_v58, %v682_v47 }
  0xeb   :  { %475 = vpow2.f32 %v327_v14  ;;  %v754_v51 = vadd.f32 %v263_v61, %v256_v36  ;;  %v287_v15 = vsub.f32 0.0, %v738_v23  ;;  %v303_v37 = vmul.f32 1.442695, %v284_v18 }
  0xec   :  { %v757_v38 = vadd.f32 %v263_v61, %v257_v25  ;;  %v759_v28 = vadd.f32 %v263_v61, %v258_v26  ;;  %v288_v39 = vsub.f32 0.0, %v744_v12  ;;  %477 = vpow2.f32 %v297_v33 }
  0xed   :  { %v762_v41 = vadd.f32 %v263_v61, %v259_v27  ;;  %v289_v42 = vsub.f32 0.0, %v747_v29  ;;  %479 = vpow2.f32 %v299_v34  ;;  %v305_v43 = vmul.f32 1.442695, %v285_v30 }
  0xee   :  { %v290_v44 = vsub.f32 0.0, %v751_v31  ;;  %481 = vpow2.f32 %v301_v35  ;;  %v307_v45 = vmul.f32 1.442695, %v286_v16  ;;  %v766_v46 = vadd.f32 %v263_v61, %v260_v32 }
  0xef   :  { %v291_v48 = vsub.f32 0.0, %v754_v51  ;;  %483 = vpow2.f32 %v303_v37  ;;  %v309_v49 = vmul.f32 1.442695, %v287_v15  ;;  %v292_v50 = vsub.f32 0.0, %v757_v38 }
  0xf0   :  { %v311_v52 = vmul.f32 1.442695, %v288_v39  ;;  %v293_v53 = vsub.f32 0.0, %v759_v28  ;;  %v313_v54 = vmul.f32 1.442695, %v289_v42  ;;  %v294_v56 = vsub.f32 0.0, %v762_v41 }
  0xf1   :  { %v476_v40 = vpop.eup %475  ;;  %v315_v57 = vmul.f32 1.442695, %v290_v44  ;;  %v295_v59 = vsub.f32 0.0, %v766_v46  ;;  %v317_v60 = vmul.f32 1.442695, %v291_v48 }
  0xf2   :  { %v344_v47 = vadd.f32 1.0, %v476_v40  ;;  %v478_v55 = vpop.eup %477  ;;  %v319_v62 = vmul.f32 1.442695, %v292_v50  ;;  %v321_v0 = vmul.f32 1.442695, %v293_v53 }
  0xf3   :  { %v480_v58 = vpop.eup %479  ;;  %v323_v7 = vmul.f32 1.442695, %v294_v56  ;;  %v325_v11 = vmul.f32 1.442695, %v295_v59  ;;  %v329_v17 = vadd.f32 1.0, %v478_v55 }
  0xf4   :  { %485 = vrcp.f32 %v344_v47  ;;  %v482_v61 = vpop.eup %481  ;;  %v330_v21 = vadd.f32 1.0, %v480_v58 }
  0xf5   :  { %487 = vpow2.f32 %v305_v43  ;;  %v484_v63 = vpop.eup %483  ;;  %v331_v10 = vadd.f32 1.0, %v482_v61 }
  0xf6   :  { %489 = vpow2.f32 %v307_v45  ;;  %v332_v18 = vadd.f32 1.0, %v484_v63 }
  0xf7   :  { %491 = vpow2.f32 %v309_v49 }
  0xf8   :  { %493 = vpow2.f32 %v311_v52 }
  0xf9   :  { %495 = vpow2.f32 %v313_v54 }
  0xfa   :  { %v486_v3 = vpop.eup %485  ;;  %497 = vpow2.f32 %v315_v57 }
  0xfb   :  { %v488_v2 = vpop.eup %487  ;;  %v376_v9 = vmul.f32 %v486_v3, %v713_v1  ;;  %499 = vpow2.f32 %v317_v60 }
  0xfc   :  { %v490_v14 = vpop.eup %489  ;;  %501 = vpow2.f32 %v319_v62  ;;  %v333_v25 = vadd.f32 1.0, %v488_v2 }
  0xfd   :  { %v492_v20 = vpop.eup %491  ;;  %392 = vst [vmem:[#allocation2 + $0x78] sm:$0xff] %v376_v9  ;;  %503 = vpow2.f32 %v321_v0  ;;  %v334_v1 = vadd.f32 1.0, %v490_v14 }
  0xfe   :  { %v494_v22 = vpop.eup %493  ;;  %505 = vpow2.f32 %v323_v7  ;;  %v335_v30 = vadd.f32 1.0, %v492_v20 }
  0xff   :  { %v496_v13 = vpop.eup %495  ;;  %507 = vpow2.f32 %v325_v11  ;;  %v336_v33 = vadd.f32 1.0, %v494_v22 }
 0x100   :  { %v498_v36 = vpop.eup %497  ;;  %509 = vrcp.f32 %v329_v17  ;;  %v337_v35 = vadd.f32 1.0, %v496_v13 }
 0x101   :  { %v500_v26 = vpop.eup %499  ;;  %511 = vrcp.f32 %v330_v21  ;;  %v338_v15 = vadd.f32 1.0, %v498_v36 }
 0x102   :  { %v502_v27 = vpop.eup %501  ;;  %513 = vrcp.f32 %v331_v10  ;;  %v339_v39 = vadd.f32 1.0, %v500_v26 }
 0x103   :  { %v504_v16 = vpop.eup %503  ;;  %515 = vrcp.f32 %v332_v18  ;;  %v340_v42 = vadd.f32 1.0, %v502_v27 }
 0x104   :  { %v506_v34 = vpop.eup %505  ;;  %517 = vrcp.f32 %v333_v25  ;;  %v341_v44 = vadd.f32 1.0, %v504_v16 }
 0x105   :  { %v508_v32 = vpop.eup %507  ;;  %519 = vrcp.f32 %v334_v1  ;;  %v342_v49 = vadd.f32 1.0, %v506_v34 }
 0x106   :  { %v510_v37 = vpop.eup %509  ;;  %521 = vrcp.f32 %v335_v30  ;;  %v343_v53 = vadd.f32 1.0, %v508_v32 }
 0x107   :  { %v512_v40 = vpop.eup %511  ;;  %523 = vrcp.f32 %v336_v33  ;;  %v361_v43 = vmul.f32 %v510_v37, %v716_v4 }
 0x108   :  { %v514_v47 = vpop.eup %513  ;;  %525 = vrcp.f32 %v337_v35  ;;  %v362_v45 = vmul.f32 %v512_v40, %v718_v5 }
 0x109   :  { %v516_v48 = vpop.eup %515  ;;  %527 = vrcp.f32 %v338_v15  ;;  %v363_v50 = vmul.f32 %v514_v47, %v720_v6  ;;  %377 = vst [vmem:[#allocation2] sm:$0xff] %v361_v43 }
 0x10a   :  { %v518_v52 = vpop.eup %517  ;;  %529 = vrcp.f32 %v339_v39  ;;  %v364_v54 = vmul.f32 %v516_v48, %v725_v8  ;;  %378 = vst [vmem:[#allocation2 + $0x8] sm:$0xff] %v362_v45 }
 0x10b   :  { %v520_v55 = vpop.eup %519  ;;  %531 = vrcp.f32 %v340_v42  ;;  %v365_v4 = vmul.f32 %v518_v52, %v729_v24  ;;  %379 = vst [vmem:[#allocation2 + $0x10] sm:$0xff] %v363_v50 }
 0x10c   :  { %v522_v56 = vpop.eup %521  ;;  %533 = vrcp.f32 %v341_v44  ;;  %v366_v5 = vmul.f32 %v520_v55, %v731_v19  ;;  %380 = vst [vmem:[#allocation2 + $0x18] sm:$0xff] %v364_v54 }
 0x10d   :  { %v524_v57 = vpop.eup %523  ;;  %535 = vrcp.f32 %v342_v49  ;;  %v367_v6 = vmul.f32 %v522_v56, %v738_v23  ;;  %381 = vst [vmem:[#allocation2 + $0x20] sm:$0xff] %v365_v4 }
 0x10e   :  { %v526_v58 = vpop.eup %525  ;;  %537 = vrcp.f32 %v343_v53  ;;  %v368_v8 = vmul.f32 %v524_v57, %v744_v12  ;;  %382 = vst [vmem:[#allocation2 + $0x28] sm:$0xff] %v366_v5 }
 0x10f   :  { %v528_v59 = vpop.eup %527  ;;  %v369_v60 = vmul.f32 %v526_v58, %v747_v29  ;;  %383 = vst [vmem:[#allocation2 + $0x30] sm:$0xff] %v367_v6 }
 0x110   :  { %v530_v24 = vpop.eup %529  ;;  %v370_v61 = vmul.f32 %v528_v59, %v751_v31  ;;  %384 = vst [vmem:[#allocation2 + $0x38] sm:$0xff] %v368_v8 }
 0x111   :  { %v532_v19 = vpop.eup %531  ;;  %v371_v62 = vmul.f32 %v530_v24, %v754_v51  ;;  %385 = vst [vmem:[#allocation2 + $0x40] sm:$0xff] %v369_v60 }
 0x112   :  { %v534_v23 = vpop.eup %533  ;;  %v372_v12 = vmul.f32 %v532_v19, %v757_v38  ;;  %386 = vst [vmem:[#allocation2 + $0x48] sm:$0xff] %v370_v61 }
 0x113   :  { %v536_v29 = vpop.eup %535  ;;  %v373_v63 = vmul.f32 %v534_v23, %v759_v28  ;;  %387 = vst [vmem:[#allocation2 + $0x50] sm:$0xff] %v371_v62 }
 0x114   :  { %v538_v31 = vpop.eup %537  ;;  %v374_v0 = vmul.f32 %v536_v29, %v762_v41  ;;  %388 = vst [vmem:[#allocation2 + $0x58] sm:$0xff] %v372_v12 }
 0x115   :  { %v375_v51 = vmul.f32 %v538_v31, %v766_v46  ;;  %389 = vst [vmem:[#allocation2 + $0x60] sm:$0xff] %v373_v63 }
 0x116   :  { %390 = vst [vmem:[#allocation2 + $0x68] sm:$0xff] %v374_v0 }
 0x117   :  { %391 = vst [vmem:[#allocation2 + $0x70] sm:$0xff] %v375_v51 }
 0x118   :  { %405 = dma.vmem_to_hbm [thread:$0]  %s398_s3, 2048, %s400_s11, [#allocation3], %s567_s4, %s567_s4, %s568_s12  }
 0x119   :  { %563 = dma.done.wait [#allocation3], 2048  }
 0x11a   :  { %564 = vsyncadd [#allocation3], 4294965248 }
 0x11b   :  { %410 = vsyncpa [#allocation3], 1 }

</bundles_post_ra>
